<compile_context>
chip_gen: v6e
topology: v6e:2x2x1
jax: 0.10.0
libtpu: 0.0.40
codegen_flags: <defaults>
</compile_context>

<pallas_src>
import functools

import jax
import jax.numpy as jnp
from jax import lax
from jax.experimental import pallas as pl
from jax.experimental.pallas import tpu as pltpu


ROW_CHUNK = 8  # one f32 vreg worth of sublanes


def conv_kernel(x_ref, w1_ref, b1_ref, w2_ref, b2_ref, o_ref, *, l_real, row_chunk):
    """One grid step: a (bn_tile, Lp) slab of rows, all channels.

    x_ref : VMEM (d,  bn_tile, Lp)  input, channel-major (Lp = lane-padded L)
    w1_ref: SMEM (c1*d*3,)          conv1 weight, flattened (j, c, k) row-major
    b1_ref: SMEM (c1,)              conv1 bias
    w2_ref: SMEM (c2*c1*5,)         conv2 weight, flattened (j, c, k) row-major
    b2_ref: SMEM (c2,)              conv2 bias
    o_ref : VMEM (c2, bn_tile, Lp)  output
    """
    d, bn_t, Lp = x_ref.shape
    c1 = b1_ref.shape[0]
    c2 = b2_ref.shape[0]
    n_chunks = bn_t // row_chunk

    # Boundary masks, hoisted: they depend only on the tap offset (+-1, +-2),
    # not on the channel or sub-slab.  Applied once per (out-channel, offset)
    # on the channel-summed partial, so masking costs ~8 selects per output
    # slab vs ~34 FMAs of real conv work.
    lane = lax.broadcasted_iota(jnp.int32, (row_chunk, Lp), 1)
    masks = {off: jnp.logical_and(lane + off >= 0, lane + off < l_real)
             for off in (-2, -1, 1, 2)}

    def rolled(v, off):
        # rolled[i] = v[(i + off) % Lp]   (XLU slot -> nearly free vs VALU)
        return pltpu.roll(v, shift=(-off) % Lp, axis=1)

    def process(rbase):
        rows = pl.ds(rbase, row_chunk)

        # ---- Conv1d(d -> c1, k=3, pad=1) + ReLU : VPU broadcast-FMAs --------
        # (bf16 inputs are upcast here; on v6e/v7x a bf16 path would halve vreg
        #  pressure, but the shipped module is f32 and v5e has no bf16 VALU.)
        x = [x_ref[c, rows, :].astype(jnp.float32) for c in range(d)]
        xr = {off: [rolled(x[c], off) for c in range(d)] for off in (-1, 1)}
        y1 = []
        for j in range(c1):
            acc = jnp.zeros((row_chunk, Lp), jnp.float32)
            for c in range(d):                          # center tap (k=1), no mask
                acc = acc + w1_ref[(j * d + c) * 3 + 1] * x[c]
            for off in (-1, 1):                         # edge taps, mask factored
                k = off + 1
                part = jnp.zeros((row_chunk, Lp), jnp.float32)
                for c in range(d):
                    part = part + w1_ref[(j * d + c) * 3 + k] * xr[off][c]
                acc = acc + jnp.where(masks[off], part, 0.0)
            y1.append(jnp.maximum(acc + b1_ref[j], 0.0))

        # ---- Conv1d(c1 -> c2, k=5, pad=2) + ReLU -----------------------------
        y1r = {off: [rolled(y1[c], off) for c in range(c1)]
               for off in (-2, -1, 1, 2)}
        for j in range(c2):
            acc = jnp.zeros((row_chunk, Lp), jnp.float32)
            for c in range(c1):                         # center tap (k=2)
                acc = acc + w2_ref[(j * c1 + c) * 5 + 2] * y1[c]
            for off in (-2, -1, 1, 2):
                k = off + 2
                part = jnp.zeros((row_chunk, Lp), jnp.float32)
                for c in range(c1):
                    part = part + w2_ref[(j * c1 + c) * 5 + k] * y1r[off][c]
                # mask also zero-pads y1 exactly like PyTorch's conv2 padding,
                # so y1's lane-pad garbage (when Lp > l) never leaks in.
                acc = acc + jnp.where(masks[off], part, 0.0)
            # TODO(synk): nn.Dropout(score_dropout) is identity at inference; not applied.
            o_ref[j, rows, :] = jnp.maximum(acc + b2_ref[j], 0.0).astype(o_ref.dtype)

    if n_chunks == 1:
        process(0)
    else:
        # Large-bn reuse path: keep the ~22 tap slabs live only per 8-row
        # sub-slab so vreg pressure stays bounded at big tiles.
        def body(i, carry):
            process(pl.multiple_of(i * row_chunk, row_chunk))
            return carry
        lax.fori_loop(0, n_chunks, body, 0, unroll=min(n_chunks, 8))


def conv_forward(x, w1, b1, w2, b2):
    """x: (b, n, l, d); PyTorch Conv1d weights w1 (c1, d, 3), w2 (c2, c1, 5)."""
    b, n, l, d = x.shape
    c1, c2 = d // 2, d // 4
    assert d >= 4, "in_channels must be >= 4"
    # The module's `output.view(b, n, 1, l)` itself requires in_channels // 4 == 1.
    assert c2 == 1, "Conv module semantics require in_channels // 4 == 1 (d == 4..7)"
    bn = b * n

    # ---- tiling --------------------------------------------------------------
    Lp = int(pl.cdiv(l, 128)) * 128                  # lane-dense (unmasked) stores
    bn8 = int(pl.cdiv(bn, ROW_CHUNK)) * ROW_CHUNK

    # Size tiles by VMEM (v7x: 64 MiB physical / 32 MiB scoped default): keep the
    # double-buffered in+out footprint of a grid step <= ~8 MiB on every gen.
    vmem_budget = 8 << 20
    bytes_per_row = 2 * (d + c2) * Lp * 4
    max_rows = max(ROW_CHUNK,
                   (vmem_budget // bytes_per_row) // ROW_CHUNK * ROW_CHUNK)

    if bn8 <= max_rows:
        # Single grid step: on single-TC chips (v5e/v6e) extra steps only add the
        # fixed ~0.35us per-step overhead for this tiny per-step compute.
        num_steps = 1
        if bn8 >= 256:
            # 2-way megacore split (v7x) only once each half has enough rows to
            # amortize the per-step overhead.
            num_steps = 2
    else:
        num_steps = int(pl.cdiv(bn8, max_rows))

    bn_pad = int(pl.cdiv(bn8, num_steps * ROW_CHUNK)) * num_steps * ROW_CHUNK
    bn_tile = bn_pad // num_steps

    # glue (the module's own view + transpose): (b,n,l,d) -> (d, bn_pad, Lp).
    # TODO(synk): the real fix is a channel-major producer upstream; here the
    # reshape/transpose(/pad) chain is one jitted op and the pallas call allows
    # input fusion so XLA can skip a separate HBM materialization of `xt`.
    xt = jnp.transpose(x.reshape(bn, l, d), (2, 0, 1))
    if bn_pad != bn or Lp != l:
        xt = jnp.pad(xt, ((0, 0), (0, bn_pad - bn), (0, Lp - l)))

    kernel = functools.partial(conv_kernel, l_real=l, row_chunk=ROW_CHUNK)
    smem = pl.BlockSpec(memory_space=pltpu.MemorySpace.SMEM)
    if num_steps >= 3:
        # v5e: deeper input buffering once DMA per step could be exposed.
        x_spec = pl.BlockSpec((d, bn_tile, Lp), lambda i: (0, i, 0),
                              pipeline_mode=pl.Buffered(3))
    else:
        x_spec = pl.BlockSpec((d, bn_tile, Lp), lambda i: (0, i, 0))

    out = pl.pallas_call(
        kernel,
        out_shape=jax.ShapeDtypeStruct((c2, bn_pad, Lp), x.dtype),
        grid=(num_steps,),
        in_specs=[x_spec, smem, smem, smem, smem],
        out_specs=pl.BlockSpec((c2, bn_tile, Lp), lambda i: (0, i, 0)),
        compiler_params=pltpu.CompilerParams(
            dimension_semantics=("parallel",),
            allow_input_fusion=[True, False, False, False, False],
        ),
    )(xt, w1.reshape(-1), b1, w2.reshape(-1), b2)

    # output.view(b, n, 1, l).squeeze(2) -> (b, n, l); drop row/lane padding.
    return out[0, :bn, :l].reshape(b, n, l)


def reference_forward(x, w1, b1, w2, b2):
    """Pure-JAX reference using lax.conv_general_dilated (matches PyTorch Conv1d)."""
    b, n, l, d = x.shape
    xt = jnp.transpose(x.reshape(b * n, l, d), (0, 2, 1))     # (BN, d, l)
    dn = ("NCH", "OIH", "NCH")
    y1 = lax.conv_general_dilated(xt, w1, window_strides=(1,),
                                  padding=[(1, 1)], dimension_numbers=dn)
    y1 = jnp.maximum(y1 + b1[None, :, None], 0.0)
    y2 = lax.conv_general_dilated(y1, w2, window_strides=(1,),
                                  padding=[(2, 2)], dimension_numbers=dn)
    y2 = jnp.maximum(y2 + b2[None, :, None], 0.0)
    return y2.reshape(b, n, l)


if __name__ == "__main__":
    key = jax.random.PRNGKey(0)
    k_x, k_w1, k_b1, k_w2, k_b2 = jax.random.split(key, 5)

    b, n, l, d = 2, 4, 128, 4          # in_channels = d = 4, bn = 8, L = 128
    c1, c2 = d // 2, d // 4

    x = jax.random.normal(k_x, (b, n, l, d), dtype=jnp.float32)

    # deterministic parameter init (uniform, PyTorch-like fan-in bound)
    bound1 = 1.0 / (d * 3) ** 0.5
    w1 = jax.random.uniform(k_w1, (c1, d, 3), jnp.float32, -bound1, bound1)
    b1 = jax.random.uniform(k_b1, (c1,), jnp.float32, -bound1, bound1)
    bound2 = 1.0 / (c1 * 5) ** 0.5
    w2 = jax.random.uniform(k_w2, (c2, c1, 5), jnp.float32, -bound2, bound2)
    b2 = jax.random.uniform(k_b2, (c2,), jnp.float32, -bound2, bound2)

    conv_forward_jit = jax.jit(conv_forward)
    out = conv_forward_jit(x, w1, b1, w2, b2)
    out = jax.block_until_ready(out)

    ref = reference_forward(x, w1, b1, w2, b2)
    assert out.shape == (b, n, l), out.shape
    assert jnp.allclose(out, ref, atol=1e-5, rtol=1e-5), float(
        jnp.max(jnp.abs(out - ref)))

    print("KERNEL_OK")
</pallas_src>

<mosaic_0001>
module attributes {stable_mosaic.version = 11 : i64} {
  func.func @conv_kernel(%arg0: i32, %arg1: memref<4x8x128xf32, #tpu.memory_space<vmem>>, %arg2: memref<24xf32, #tpu.memory_space<smem>>, %arg3: memref<2xf32, #tpu.memory_space<smem>>, %arg4: memref<10xf32, #tpu.memory_space<smem>>, %arg5: memref<1xf32, #tpu.memory_space<smem>>, %arg6: memref<1x8x128xf32, #tpu.memory_space<vmem>>) attributes {dimension_semantics = [#tpu.dimension_semantics<parallel>], iteration_bounds = array<i64: 1>, scalar_prefetch = 0 : i64, scratch_operands = 0 : i64, tpu.core_type = #tpu.core_type<tc>, window_params = [{transform_indices = @transform_0, window_bounds = array<i64: 4, 8, 128>}, {transform_indices = @transform_1, window_bounds = array<i64: 24>}, {transform_indices = @transform_2, window_bounds = array<i64: 2>}, {transform_indices = @transform_3, window_bounds = array<i64: 10>}, {transform_indices = @transform_4, window_bounds = array<i64: 1>}, {transform_indices = @transform_5, window_bounds = array<i64: 1, 8, 128>}]} {
    %0 = tpu.iota {dimensions = array<i32: 1>} : vector<8x128xi32>
    %c-2_i32 = arith.constant -2 : i32
    %1 = vector.broadcast %c-2_i32 : i32 to vector<8x128xi32>
    %2 = arith.addi %0, %1 : vector<8x128xi32>
    %c0_i32 = arith.constant 0 : i32
    %3 = vector.broadcast %c0_i32 : i32 to vector<8x128xi32>
    %4 = arith.cmpi sge, %2, %3 : vector<8x128xi32>
    %c-2_i32_0 = arith.constant -2 : i32
    %5 = vector.broadcast %c-2_i32_0 : i32 to vector<8x128xi32>
    %6 = arith.addi %0, %5 : vector<8x128xi32>
    %c128_i32 = arith.constant 128 : i32
    %7 = vector.broadcast %c128_i32 : i32 to vector<8x128xi32>
    %8 = arith.cmpi slt, %6, %7 : vector<8x128xi32>
    %9 = arith.andi %4, %8 : vector<8x128xi1>
    %c-1_i32 = arith.constant -1 : i32
    %10 = vector.broadcast %c-1_i32 : i32 to vector<8x128xi32>
    %11 = arith.addi %0, %10 : vector<8x128xi32>
    %c0_i32_1 = arith.constant 0 : i32
    %12 = vector.broadcast %c0_i32_1 : i32 to vector<8x128xi32>
    %13 = arith.cmpi sge, %11, %12 : vector<8x128xi32>
    %c-1_i32_2 = arith.constant -1 : i32
    %14 = vector.broadcast %c-1_i32_2 : i32 to vector<8x128xi32>
    %15 = arith.addi %0, %14 : vector<8x128xi32>
    %c128_i32_3 = arith.constant 128 : i32
    %16 = vector.broadcast %c128_i32_3 : i32 to vector<8x128xi32>
    %17 = arith.cmpi slt, %15, %16 : vector<8x128xi32>
    %18 = arith.andi %13, %17 : vector<8x128xi1>
    %c1_i32 = arith.constant 1 : i32
    %19 = vector.broadcast %c1_i32 : i32 to vector<8x128xi32>
    %20 = arith.addi %0, %19 : vector<8x128xi32>
    %c0_i32_4 = arith.constant 0 : i32
    %21 = vector.broadcast %c0_i32_4 : i32 to vector<8x128xi32>
    %22 = arith.cmpi sge, %20, %21 : vector<8x128xi32>
    %c1_i32_5 = arith.constant 1 : i32
    %23 = vector.broadcast %c1_i32_5 : i32 to vector<8x128xi32>
    %24 = arith.addi %0, %23 : vector<8x128xi32>
    %c128_i32_6 = arith.constant 128 : i32
    %25 = vector.broadcast %c128_i32_6 : i32 to vector<8x128xi32>
    %26 = arith.cmpi slt, %24, %25 : vector<8x128xi32>
    %27 = arith.andi %22, %26 : vector<8x128xi1>
    %c2_i32 = arith.constant 2 : i32
    %28 = vector.broadcast %c2_i32 : i32 to vector<8x128xi32>
    %29 = arith.addi %0, %28 : vector<8x128xi32>
    %c0_i32_7 = arith.constant 0 : i32
    %30 = vector.broadcast %c0_i32_7 : i32 to vector<8x128xi32>
    %31 = arith.cmpi sge, %29, %30 : vector<8x128xi32>
    %c2_i32_8 = arith.constant 2 : i32
    %32 = vector.broadcast %c2_i32_8 : i32 to vector<8x128xi32>
    %33 = arith.addi %0, %32 : vector<8x128xi32>
    %c128_i32_9 = arith.constant 128 : i32
    %34 = vector.broadcast %c128_i32_9 : i32 to vector<8x128xi32>
    %35 = arith.cmpi slt, %33, %34 : vector<8x128xi32>
    %36 = arith.andi %31, %35 : vector<8x128xi1>
    %c0 = arith.constant 0 : index
    %c0_10 = arith.constant 0 : index
    %c0_11 = arith.constant 0 : index
    %37 = vector.load %arg1[%c0, %c0_10, %c0_11] : memref<4x8x128xf32, #tpu.memory_space<vmem>>, vector<1x8x128xf32>
    %38 = vector.shape_cast %37 : vector<1x8x128xf32> to vector<8x128xf32>
    %c1 = arith.constant 1 : index
    %c0_12 = arith.constant 0 : index
    %c0_13 = arith.constant 0 : index
    %39 = vector.load %arg1[%c1, %c0_12, %c0_13] : memref<4x8x128xf32, #tpu.memory_space<vmem>>, vector<1x8x128xf32>
    %40 = vector.shape_cast %39 : vector<1x8x128xf32> to vector<8x128xf32>
    %c2 = arith.constant 2 : index
    %c0_14 = arith.constant 0 : index
    %c0_15 = arith.constant 0 : index
    %41 = vector.load %arg1[%c2, %c0_14, %c0_15] : memref<4x8x128xf32, #tpu.memory_space<vmem>>, vector<1x8x128xf32>
    %42 = vector.shape_cast %41 : vector<1x8x128xf32> to vector<8x128xf32>
    %c3 = arith.constant 3 : index
    %c0_16 = arith.constant 0 : index
    %c0_17 = arith.constant 0 : index
    %43 = vector.load %arg1[%c3, %c0_16, %c0_17] : memref<4x8x128xf32, #tpu.memory_space<vmem>>, vector<1x8x128xf32>
    %44 = vector.shape_cast %43 : vector<1x8x128xf32> to vector<8x128xf32>
    %c1_i32_18 = arith.constant 1 : i32
    %45 = tpu.dynamic_rotate %38 by %c1_i32_18 dim 1 : vector<8x128xf32>, i32 -> vector<8x128xf32>
    %c1_i32_19 = arith.constant 1 : i32
    %46 = tpu.dynamic_rotate %40 by %c1_i32_19 dim 1 : vector<8x128xf32>, i32 -> vector<8x128xf32>
    %c1_i32_20 = arith.constant 1 : i32
    %47 = tpu.dynamic_rotate %42 by %c1_i32_20 dim 1 : vector<8x128xf32>, i32 -> vector<8x128xf32>
    %c1_i32_21 = arith.constant 1 : i32
    %48 = tpu.dynamic_rotate %44 by %c1_i32_21 dim 1 : vector<8x128xf32>, i32 -> vector<8x128xf32>
    %c127_i32 = arith.constant 127 : i32
    %49 = tpu.dynamic_rotate %38 by %c127_i32 dim 1 : vector<8x128xf32>, i32 -> vector<8x128xf32>
    %c127_i32_22 = arith.constant 127 : i32
    %50 = tpu.dynamic_rotate %40 by %c127_i32_22 dim 1 : vector<8x128xf32>, i32 -> vector<8x128xf32>
    %c127_i32_23 = arith.constant 127 : i32
    %51 = tpu.dynamic_rotate %42 by %c127_i32_23 dim 1 : vector<8x128xf32>, i32 -> vector<8x128xf32>
    %c127_i32_24 = arith.constant 127 : i32
    %52 = tpu.dynamic_rotate %44 by %c127_i32_24 dim 1 : vector<8x128xf32>, i32 -> vector<8x128xf32>
    %cst = arith.constant 0.000000e+00 : f32
    %53 = vector.broadcast %cst : f32 to vector<8x128xf32>
    %c1_25 = arith.constant 1 : index
    %54 = memref.load %arg2[%c1_25] : memref<24xf32, #tpu.memory_space<smem>>
    %55 = vector.broadcast %54 : f32 to vector<8x128xf32>
    %56 = arith.mulf %55, %38 : vector<8x128xf32>
    %57 = arith.addf %53, %56 : vector<8x128xf32>
    %c4 = arith.constant 4 : index
    %58 = memref.load %arg2[%c4] : memref<24xf32, #tpu.memory_space<smem>>
    %59 = vector.broadcast %58 : f32 to vector<8x128xf32>
    %60 = arith.mulf %59, %40 : vector<8x128xf32>
    %61 = arith.addf %57, %60 : vector<8x128xf32>
    %c7 = arith.constant 7 : index
    %62 = memref.load %arg2[%c7] : memref<24xf32, #tpu.memory_space<smem>>
    %63 = vector.broadcast %62 : f32 to vector<8x128xf32>
    %64 = arith.mulf %63, %42 : vector<8x128xf32>
    %65 = arith.addf %61, %64 : vector<8x128xf32>
    %c10 = arith.constant 10 : index
    %66 = memref.load %arg2[%c10] : memref<24xf32, #tpu.memory_space<smem>>
    %67 = vector.broadcast %66 : f32 to vector<8x128xf32>
    %68 = arith.mulf %67, %44 : vector<8x128xf32>
    %69 = arith.addf %65, %68 : vector<8x128xf32>
    %cst_26 = arith.constant 0.000000e+00 : f32
    %70 = vector.broadcast %cst_26 : f32 to vector<8x128xf32>
    %c0_27 = arith.constant 0 : index
    %71 = memref.load %arg2[%c0_27] : memref<24xf32, #tpu.memory_space<smem>>
    %72 = vector.broadcast %71 : f32 to vector<8x128xf32>
    %73 = arith.mulf %72, %45 : vector<8x128xf32>
    %74 = arith.addf %70, %73 : vector<8x128xf32>
    %c3_28 = arith.constant 3 : index
    %75 = memref.load %arg2[%c3_28] : memref<24xf32, #tpu.memory_space<smem>>
    %76 = vector.broadcast %75 : f32 to vector<8x128xf32>
    %77 = arith.mulf %76, %46 : vector<8x128xf32>
    %78 = arith.addf %74, %77 : vector<8x128xf32>
    %c6 = arith.constant 6 : index
    %79 = memref.load %arg2[%c6] : memref<24xf32, #tpu.memory_space<smem>>
    %80 = vector.broadcast %79 : f32 to vector<8x128xf32>
    %81 = arith.mulf %80, %47 : vector<8x128xf32>
    %82 = arith.addf %78, %81 : vector<8x128xf32>
    %c9 = arith.constant 9 : index
    %83 = memref.load %arg2[%c9] : memref<24xf32, #tpu.memory_space<smem>>
    %84 = vector.broadcast %83 : f32 to vector<8x128xf32>
    %85 = arith.mulf %84, %48 : vector<8x128xf32>
    %86 = arith.addf %82, %85 : vector<8x128xf32>
    %cst_29 = arith.constant 0.000000e+00 : f32
    %87 = vector.broadcast %cst_29 : f32 to vector<8x128xf32>
    %88 = arith.select %18, %86, %87 : vector<8x128xi1>, vector<8x128xf32>
    %89 = arith.addf %69, %88 : vector<8x128xf32>
    %cst_30 = arith.constant 0.000000e+00 : f32
    %90 = vector.broadcast %cst_30 : f32 to vector<8x128xf32>
    %c2_31 = arith.constant 2 : index
    %91 = memref.load %arg2[%c2_31] : memref<24xf32, #tpu.memory_space<smem>>
    %92 = vector.broadcast %91 : f32 to vector<8x128xf32>
    %93 = arith.mulf %92, %49 : vector<8x128xf32>
    %94 = arith.addf %90, %93 : vector<8x128xf32>
    %c5 = arith.constant 5 : index
    %95 = memref.load %arg2[%c5] : memref<24xf32, #tpu.memory_space<smem>>
    %96 = vector.broadcast %95 : f32 to vector<8x128xf32>
    %97 = arith.mulf %96, %50 : vector<8x128xf32>
    %98 = arith.addf %94, %97 : vector<8x128xf32>
    %c8 = arith.constant 8 : index
    %99 = memref.load %arg2[%c8] : memref<24xf32, #tpu.memory_space<smem>>
    %100 = vector.broadcast %99 : f32 to vector<8x128xf32>
    %101 = arith.mulf %100, %51 : vector<8x128xf32>
    %102 = arith.addf %98, %101 : vector<8x128xf32>
    %c11 = arith.constant 11 : index
    %103 = memref.load %arg2[%c11] : memref<24xf32, #tpu.memory_space<smem>>
    %104 = vector.broadcast %103 : f32 to vector<8x128xf32>
    %105 = arith.mulf %104, %52 : vector<8x128xf32>
    %106 = arith.addf %102, %105 : vector<8x128xf32>
    %cst_32 = arith.constant 0.000000e+00 : f32
    %107 = vector.broadcast %cst_32 : f32 to vector<8x128xf32>
    %108 = arith.select %27, %106, %107 : vector<8x128xi1>, vector<8x128xf32>
    %109 = arith.addf %89, %108 : vector<8x128xf32>
    %c0_33 = arith.constant 0 : index
    %110 = memref.load %arg3[%c0_33] : memref<2xf32, #tpu.memory_space<smem>>
    %111 = vector.broadcast %110 : f32 to vector<8x128xf32>
    %112 = arith.addf %109, %111 : vector<8x128xf32>
    %cst_34 = arith.constant 0.000000e+00 : f32
    %113 = vector.broadcast %cst_34 : f32 to vector<8x128xf32>
    %114 = arith.maximumf %112, %113 : vector<8x128xf32>
    %cst_35 = arith.constant 0.000000e+00 : f32
    %115 = vector.broadcast %cst_35 : f32 to vector<8x128xf32>
    %c13 = arith.constant 13 : index
    %116 = memref.load %arg2[%c13] : memref<24xf32, #tpu.memory_space<smem>>
    %117 = vector.broadcast %116 : f32 to vector<8x128xf32>
    %118 = arith.mulf %117, %38 : vector<8x128xf32>
    %119 = arith.addf %115, %118 : vector<8x128xf32>
    %c16 = arith.constant 16 : index
    %120 = memref.load %arg2[%c16] : memref<24xf32, #tpu.memory_space<smem>>
    %121 = vector.broadcast %120 : f32 to vector<8x128xf32>
    %122 = arith.mulf %121, %40 : vector<8x128xf32>
    %123 = arith.addf %119, %122 : vector<8x128xf32>
    %c19 = arith.constant 19 : index
    %124 = memref.load %arg2[%c19] : memref<24xf32, #tpu.memory_space<smem>>
    %125 = vector.broadcast %124 : f32 to vector<8x128xf32>
    %126 = arith.mulf %125, %42 : vector<8x128xf32>
    %127 = arith.addf %123, %126 : vector<8x128xf32>
    %c22 = arith.constant 22 : index
    %128 = memref.load %arg2[%c22] : memref<24xf32, #tpu.memory_space<smem>>
    %129 = vector.broadcast %128 : f32 to vector<8x128xf32>
    %130 = arith.mulf %129, %44 : vector<8x128xf32>
    %131 = arith.addf %127, %130 : vector<8x128xf32>
    %cst_36 = arith.constant 0.000000e+00 : f32
    %132 = vector.broadcast %cst_36 : f32 to vector<8x128xf32>
    %c12 = arith.constant 12 : index
    %133 = memref.load %arg2[%c12] : memref<24xf32, #tpu.memory_space<smem>>
    %134 = vector.broadcast %133 : f32 to vector<8x128xf32>
    %135 = arith.mulf %134, %45 : vector<8x128xf32>
    %136 = arith.addf %132, %135 : vector<8x128xf32>
    %c15 = arith.constant 15 : index
    %137 = memref.load %arg2[%c15] : memref<24xf32, #tpu.memory_space<smem>>
    %138 = vector.broadcast %137 : f32 to vector<8x128xf32>
    %139 = arith.mulf %138, %46 : vector<8x128xf32>
    %140 = arith.addf %136, %139 : vector<8x128xf32>
    %c18 = arith.constant 18 : index
    %141 = memref.load %arg2[%c18] : memref<24xf32, #tpu.memory_space<smem>>
    %142 = vector.broadcast %141 : f32 to vector<8x128xf32>
    %143 = arith.mulf %142, %47 : vector<8x128xf32>
    %144 = arith.addf %140, %143 : vector<8x128xf32>
    %c21 = arith.constant 21 : index
    %145 = memref.load %arg2[%c21] : memref<24xf32, #tpu.memory_space<smem>>
    %146 = vector.broadcast %145 : f32 to vector<8x128xf32>
    %147 = arith.mulf %146, %48 : vector<8x128xf32>
    %148 = arith.addf %144, %147 : vector<8x128xf32>
    %cst_37 = arith.constant 0.000000e+00 : f32
    %149 = vector.broadcast %cst_37 : f32 to vector<8x128xf32>
    %150 = arith.select %18, %148, %149 : vector<8x128xi1>, vector<8x128xf32>
    %151 = arith.addf %131, %150 : vector<8x128xf32>
    %cst_38 = arith.constant 0.000000e+00 : f32
    %152 = vector.broadcast %cst_38 : f32 to vector<8x128xf32>
    %c14 = arith.constant 14 : index
    %153 = memref.load %arg2[%c14] : memref<24xf32, #tpu.memory_space<smem>>
    %154 = vector.broadcast %153 : f32 to vector<8x128xf32>
    %155 = arith.mulf %154, %49 : vector<8x128xf32>
    %156 = arith.addf %152, %155 : vector<8x128xf32>
    %c17 = arith.constant 17 : index
    %157 = memref.load %arg2[%c17] : memref<24xf32, #tpu.memory_space<smem>>
    %158 = vector.broadcast %157 : f32 to vector<8x128xf32>
    %159 = arith.mulf %158, %50 : vector<8x128xf32>
    %160 = arith.addf %156, %159 : vector<8x128xf32>
    %c20 = arith.constant 20 : index
    %161 = memref.load %arg2[%c20] : memref<24xf32, #tpu.memory_space<smem>>
    %162 = vector.broadcast %161 : f32 to vector<8x128xf32>
    %163 = arith.mulf %162, %51 : vector<8x128xf32>
    %164 = arith.addf %160, %163 : vector<8x128xf32>
    %c23 = arith.constant 23 : index
    %165 = memref.load %arg2[%c23] : memref<24xf32, #tpu.memory_space<smem>>
    %166 = vector.broadcast %165 : f32 to vector<8x128xf32>
    %167 = arith.mulf %166, %52 : vector<8x128xf32>
    %168 = arith.addf %164, %167 : vector<8x128xf32>
    %cst_39 = arith.constant 0.000000e+00 : f32
    %169 = vector.broadcast %cst_39 : f32 to vector<8x128xf32>
    %170 = arith.select %27, %168, %169 : vector<8x128xi1>, vector<8x128xf32>
    %171 = arith.addf %151, %170 : vector<8x128xf32>
    %c1_40 = arith.constant 1 : index
    %172 = memref.load %arg3[%c1_40] : memref<2xf32, #tpu.memory_space<smem>>
    %173 = vector.broadcast %172 : f32 to vector<8x128xf32>
    %174 = arith.addf %171, %173 : vector<8x128xf32>
    %cst_41 = arith.constant 0.000000e+00 : f32
    %175 = vector.broadcast %cst_41 : f32 to vector<8x128xf32>
    %176 = arith.maximumf %174, %175 : vector<8x128xf32>
    %c2_i32_42 = arith.constant 2 : i32
    %177 = tpu.dynamic_rotate %114 by %c2_i32_42 dim 1 : vector<8x128xf32>, i32 -> vector<8x128xf32>
    %c2_i32_43 = arith.constant 2 : i32
    %178 = tpu.dynamic_rotate %176 by %c2_i32_43 dim 1 : vector<8x128xf32>, i32 -> vector<8x128xf32>
    %c1_i32_44 = arith.constant 1 : i32
    %179 = tpu.dynamic_rotate %114 by %c1_i32_44 dim 1 : vector<8x128xf32>, i32 -> vector<8x128xf32>
    %c1_i32_45 = arith.constant 1 : i32
    %180 = tpu.dynamic_rotate %176 by %c1_i32_45 dim 1 : vector<8x128xf32>, i32 -> vector<8x128xf32>
    %c127_i32_46 = arith.constant 127 : i32
    %181 = tpu.dynamic_rotate %114 by %c127_i32_46 dim 1 : vector<8x128xf32>, i32 -> vector<8x128xf32>
    %c127_i32_47 = arith.constant 127 : i32
    %182 = tpu.dynamic_rotate %176 by %c127_i32_47 dim 1 : vector<8x128xf32>, i32 -> vector<8x128xf32>
    %c126_i32 = arith.constant 126 : i32
    %183 = tpu.dynamic_rotate %114 by %c126_i32 dim 1 : vector<8x128xf32>, i32 -> vector<8x128xf32>
    %c126_i32_48 = arith.constant 126 : i32
    %184 = tpu.dynamic_rotate %176 by %c126_i32_48 dim 1 : vector<8x128xf32>, i32 -> vector<8x128xf32>
    %cst_49 = arith.constant 0.000000e+00 : f32
    %185 = vector.broadcast %cst_49 : f32 to vector<8x128xf32>
    %c2_50 = arith.constant 2 : index
    %186 = memref.load %arg4[%c2_50] : memref<10xf32, #tpu.memory_space<smem>>
    %187 = vector.broadcast %186 : f32 to vector<8x128xf32>
    %188 = arith.mulf %187, %114 : vector<8x128xf32>
    %189 = arith.addf %185, %188 : vector<8x128xf32>
    %c7_51 = arith.constant 7 : index
    %190 = memref.load %arg4[%c7_51] : memref<10xf32, #tpu.memory_space<smem>>
    %191 = vector.broadcast %190 : f32 to vector<8x128xf32>
    %192 = arith.mulf %191, %176 : vector<8x128xf32>
    %193 = arith.addf %189, %192 : vector<8x128xf32>
    %cst_52 = arith.constant 0.000000e+00 : f32
    %194 = vector.broadcast %cst_52 : f32 to vector<8x128xf32>
    %c0_53 = arith.constant 0 : index
    %195 = memref.load %arg4[%c0_53] : memref<10xf32, #tpu.memory_space<smem>>
    %196 = vector.broadcast %195 : f32 to vector<8x128xf32>
    %197 = arith.mulf %196, %177 : vector<8x128xf32>
    %198 = arith.addf %194, %197 : vector<8x128xf32>
    %c5_54 = arith.constant 5 : index
    %199 = memref.load %arg4[%c5_54] : memref<10xf32, #tpu.memory_space<smem>>
    %200 = vector.broadcast %199 : f32 to vector<8x128xf32>
    %201 = arith.mulf %200, %178 : vector<8x128xf32>
    %202 = arith.addf %198, %201 : vector<8x128xf32>
    %cst_55 = arith.constant 0.000000e+00 : f32
    %203 = vector.broadcast %cst_55 : f32 to vector<8x128xf32>
    %204 = arith.select %9, %202, %203 : vector<8x128xi1>, vector<8x128xf32>
    %205 = arith.addf %193, %204 : vector<8x128xf32>
    %cst_56 = arith.constant 0.000000e+00 : f32
    %206 = vector.broadcast %cst_56 : f32 to vector<8x128xf32>
    %c1_57 = arith.constant 1 : index
    %207 = memref.load %arg4[%c1_57] : memref<10xf32, #tpu.memory_space<smem>>
    %208 = vector.broadcast %207 : f32 to vector<8x128xf32>
    %209 = arith.mulf %208, %179 : vector<8x128xf32>
    %210 = arith.addf %206, %209 : vector<8x128xf32>
    %c6_58 = arith.constant 6 : index
    %211 = memref.load %arg4[%c6_58] : memref<10xf32, #tpu.memory_space<smem>>
    %212 = vector.broadcast %211 : f32 to vector<8x128xf32>
    %213 = arith.mulf %212, %180 : vector<8x128xf32>
    %214 = arith.addf %210, %213 : vector<8x128xf32>
    %cst_59 = arith.constant 0.000000e+00 : f32
    %215 = vector.broadcast %cst_59 : f32 to vector<8x128xf32>
    %216 = arith.select %18, %214, %215 : vector<8x128xi1>, vector<8x128xf32>
    %217 = arith.addf %205, %216 : vector<8x128xf32>
    %cst_60 = arith.constant 0.000000e+00 : f32
    %218 = vector.broadcast %cst_60 : f32 to vector<8x128xf32>
    %c3_61 = arith.constant 3 : index
    %219 = memref.load %arg4[%c3_61] : memref<10xf32, #tpu.memory_space<smem>>
    %220 = vector.broadcast %219 : f32 to vector<8x128xf32>
    %221 = arith.mulf %220, %181 : vector<8x128xf32>
    %222 = arith.addf %218, %221 : vector<8x128xf32>
    %c8_62 = arith.constant 8 : index
    %223 = memref.load %arg4[%c8_62] : memref<10xf32, #tpu.memory_space<smem>>
    %224 = vector.broadcast %223 : f32 to vector<8x128xf32>
    %225 = arith.mulf %224, %182 : vector<8x128xf32>
    %226 = arith.addf %222, %225 : vector<8x128xf32>
    %cst_63 = arith.constant 0.000000e+00 : f32
    %227 = vector.broadcast %cst_63 : f32 to vector<8x128xf32>
    %228 = arith.select %27, %226, %227 : vector<8x128xi1>, vector<8x128xf32>
    %229 = arith.addf %217, %228 : vector<8x128xf32>
    %cst_64 = arith.constant 0.000000e+00 : f32
    %230 = vector.broadcast %cst_64 : f32 to vector<8x128xf32>
    %c4_65 = arith.constant 4 : index
    %231 = memref.load %arg4[%c4_65] : memref<10xf32, #tpu.memory_space<smem>>
    %232 = vector.broadcast %231 : f32 to vector<8x128xf32>
    %233 = arith.mulf %232, %183 : vector<8x128xf32>
    %234 = arith.addf %230, %233 : vector<8x128xf32>
    %c9_66 = arith.constant 9 : index
    %235 = memref.load %arg4[%c9_66] : memref<10xf32, #tpu.memory_space<smem>>
    %236 = vector.broadcast %235 : f32 to vector<8x128xf32>
    %237 = arith.mulf %236, %184 : vector<8x128xf32>
    %238 = arith.addf %234, %237 : vector<8x128xf32>
    %cst_67 = arith.constant 0.000000e+00 : f32
    %239 = vector.broadcast %cst_67 : f32 to vector<8x128xf32>
    %240 = arith.select %36, %238, %239 : vector<8x128xi1>, vector<8x128xf32>
    %241 = arith.addf %229, %240 : vector<8x128xf32>
    %c0_68 = arith.constant 0 : index
    %242 = memref.load %arg5[%c0_68] : memref<1xf32, #tpu.memory_space<smem>>
    %243 = vector.broadcast %242 : f32 to vector<8x128xf32>
    %244 = arith.addf %241, %243 : vector<8x128xf32>
    %cst_69 = arith.constant 0.000000e+00 : f32
    %245 = vector.broadcast %cst_69 : f32 to vector<8x128xf32>
    %246 = arith.maximumf %244, %245 : vector<8x128xf32>
    %c0_70 = arith.constant 0 : index
    %c0_71 = arith.constant 0 : index
    %c0_72 = arith.constant 0 : index
    %247 = vector.load %arg6[%c0_70, %c0_71, %c0_72] : memref<1x8x128xf32, #tpu.memory_space<vmem>>, vector<1x8x128xf32>
    %248 = vector.shape_cast %247 : vector<1x8x128xf32> to vector<8x128xf32>
    %249 = vector.shape_cast %246 : vector<8x128xf32> to vector<1x8x128xf32>
    tpu.vector_store %arg6[%c0_70, %c0_71, %c0_72], %249 {strides = array<i32>} : memref<1x8x128xf32, #tpu.memory_space<vmem>>, vector<1x8x128xf32>,
    return
  }
  func.func @transform_0(%arg0: i32) -> (i32, i32, i32) {
    %c0_i32 = arith.constant 0 : i32
    %c0_i32_0 = arith.constant 0 : i32
    %c0_i32_1 = arith.constant 0 : i32
    return %c0_i32, %arg0, %c0_i32_0 : i32, i32, i32
  }
  func.func @transform_1(%arg0: i32) -> i32 {
    %c0_i32 = arith.constant 0 : i32
    %c0_i32_0 = arith.constant 0 : i32
    return %c0_i32 : i32
  }
  func.func @transform_2(%arg0: i32) -> i32 {
    %c0_i32 = arith.constant 0 : i32
    %c0_i32_0 = arith.constant 0 : i32
    return %c0_i32 : i32
  }
  func.func @transform_3(%arg0: i32) -> i32 {
    %c0_i32 = arith.constant 0 : i32
    %c0_i32_0 = arith.constant 0 : i32
    return %c0_i32 : i32
  }
  func.func @transform_4(%arg0: i32) -> i32 {
    %c0_i32 = arith.constant 0 : i32
    %c0_i32_0 = arith.constant 0 : i32
    return %c0_i32 : i32
  }
  func.func @transform_5(%arg0: i32) -> (i32, i32, i32) {
    %c0_i32 = arith.constant 0 : i32
    %c0_i32_0 = arith.constant 0 : i32
    %c0_i32_1 = arith.constant 0 : i32
    return %c0_i32, %arg0, %c0_i32_0 : i32, i32, i32
  }
}

</mosaic_0001>

<bundles_post_ra>
// kernel: conv_forward.1
= control target key start
LH: loop header
LB: loop body
LE: loop exit
PB: predicated region body
PF: predicated region fallthrough
CT: control target
= control target key end

     0   :  { %11 = vsyncpa [#allocation5], 0  ;;  %s548_s0 = inlined_call_operand.vmem [shape: f32[4,8,128], index: 0, kind: input, shape index: {}]   ;;  %s549_s1 = inlined_call_operand.vmem [shape: f32[24], index: 1, kind: input, shape index: {}]   ;;  %s550_s2 = inlined_call_operand.vmem [shape: f32[2], index: 2, kind: input, shape index: {}]   ;;  %s551_s3 = inlined_call_operand.vmem [shape: f32[10], index: 3, kind: input, shape index: {}]   ;;  %s552_s4 = inlined_call_operand.<no memory space> [shape: f32[1], index: 4, kind: input, shape index: {}]   ;;  %s553_s5 = inlined_call_operand.hbm [shape: f32[1,8,128], index: 5, kind: output, shape index: {}]  }
   0x1   :  { %12 = vsyncpa [#allocation7], 0  ;;  %s32_s20 = sshll.u32 %s550_s2, 4  ;;  %s33_s20 = int_to_ptr.vmem [resolvable:$true] %s32_s20 }
   0x2   :  { %13 = vsyncpa [#allocation4], 0  ;;  %s22_s23 = sshll.u32 %s549_s1, 4  ;;  %s340_s24 = scalar_lea.vmem %s33_s20, 16  ;;  %s23_s23 = int_to_ptr.vmem [resolvable:$true] %s22_s23 }
   0x3   :  { %p341_p0 = scmp.ne.s32.totalorder %s33_s20, %s340_s24  ;;  %p345_p1 = scmp.lt.s32.totalorder %s33_s20, %s33_s20 }
   0x4   :  { %p346_p2 = scmp.lt.s32.totalorder %s340_s24, %s340_s24 }
   0x6   :  { %p347_p3 = por %p346_p2, %p345_p1 }
   0x8   :  { %p348_p4 = pnand %p347_p3, %p341_p0 }
   0xa   :  { %351 = shalt.err (!%p348_p4)
}
   0xb   :  { %s402_s25 = smov [#allocation6]   ;;  %s352_s26 = scalar_lea.vmem %s23_s23, 16 }
   0xc   :  { %35 = dma.vmem_to_smem %s33_s20, 16, %s402_s25, [#allocation7]  }
   0xd   :  { %p353_p5 = scmp.ne.s32.totalorder %s23_s23, %s352_s26  ;;  %p357_p6 = scmp.lt.s32.totalorder %s23_s23, %s23_s23 }
   0xe   :  { %p358_p7 = scmp.lt.s32.totalorder %s352_s26, %s352_s26 }
  0x10   :  { %p359_p8 = por %p358_p7, %p357_p6 }
  0x12   :  { %p360_p9 = pnand %p359_p8, %p353_p5 }
  0x14   :  { %363 = shalt.err (!%p360_p9)
}
  0x15   :  { %s403_s2 = smov [#allocation3]   ;;  %s42_s28 = sshll.u32 %s551_s3, 4  ;;  %s43_s28 = int_to_ptr.vmem [resolvable:$true] %s42_s28 }
  0x16   :  { %25 = dma.vmem_to_smem %s23_s23, 16, %s403_s2, [#allocation5]  }
  0x17   :  { %s364_s29 = scalar_lea.vmem %s43_s28, 16  ;;  %p369_p11 = scmp.lt.s32.totalorder %s43_s28, %s43_s28 }
  0x18   :  { %p365_p10 = scmp.ne.s32.totalorder %s43_s28, %s364_s29  ;;  %p370_p12 = scmp.lt.s32.totalorder %s364_s29, %s364_s29 }
  0x1a   :  { %p371_p13 = por %p370_p12, %p369_p11 }
  0x1c   :  { %p372_p0 = pnand %p371_p13, %p365_p10 }
  0x1e   :  { %375 = shalt.err (!%p372_p0)
}
  0x1f   :  { %s404_s30 = smov [#allocation8]  }
  0x20   :  { %45 = dma.vmem_to_smem %s43_s28, 16, %s404_s30, [#allocation7]  }
  0x21   :  { %396 = dma.done.wait [#allocation5], 16  }
  0x22   :  { %397 = vsyncadd [#allocation5], 4294967280 }
  0x23   :  { %398 = dma.done.wait [#allocation7], 32  }
  0x24   :  { %399 = vsyncadd [#allocation7], 4294967264 }
  0x25   :  { %57 = sfence }
  0x26   :  { %v297_v0 = vld [vmem:[%s548_s0 + $0x10] sm:$0xff]  ;;  %s301_s3 = sld [smem:[#allocation3 + $0x7]]  ;;  %v76_v1 = vld [vmem:[%s548_s0] sm:$0xff]  ;;  %s405_s11 = smov 1   ;;  %v296_v2 = vld [vmem:[%s548_s0 + $0x8] sm:$0xff]  ;;  %v58_v26 = vlaneseq }
  0x27   :  { %s312_s10 = sld [smem:[#allocation3 + $0x13]]  ;;  %87 = vrot.lane.b32.xlu1 %v297_v0, %s405_s11  ;;  %83 = vrot.lane.b32.xlu0 %v76_v1, %s405_s11  ;;  %s406_s17 = smov 127   ;;  %v298_v3 = vld [vmem:[%s548_s0 + $0x18] sm:$0xff] }
  0x28   :  { %s299_s12 = sld [smem:[#allocation3 + $0x1]]  ;;  %v491_v29 = vand.u32 127, %v58_v26 }
  0x29   :  { %s310_s15 = sld [smem:[#allocation3 + $0xd]] }
  0x2a   :  { %s300_s16 = sld [smem:[#allocation3 + $0x4]]  ;;  %v502_v38 = vadd.s32 4294967295, %v491_v29 }
  0x2b   :  { %91 = vrot.lane.b32.xlu1 %v76_v1, %s406_s17  ;;  %s311_s18 = sld [smem:[#allocation3 + $0x10]]  ;;  %85 = vrot.lane.b32.xlu0 %v296_v2, %s405_s11 }
  0x2c   :  { %s302_s21 = sld [smem:[#allocation3 + $0xa]]  ;;  %v108_v4 = vstv %s301_s3  ;;  %vm65_vm0 = vcmp.ge.s32.totalorder %v502_v38, 0 }
  0x2d   :  { %s313_s22 = sld [smem:[#allocation3 + $0x16]]  ;;  %v164_v6 = vstv %s312_s10  ;;  %v109_v11 = vmul.f32 %v297_v0, %v108_v4 }
  0x2e   :  { %v100_v5 = vstv %s299_s12  ;;  %v165_v14 = vmul.f32 %v297_v0, %v164_v6  ;;  %s473_s0 = sld [smem:[#allocation3 + $0x6]] }
  0x2f   :  { %v156_v7 = vstv %s310_s15  ;;  %v101_v8 = vmul.f32 %v100_v5, %v76_v1  ;;  %89 = vrot.lane.b32.xlu1 %v298_v3, %s405_s11  ;;  %93 = vrot.lane.b32.xlu0 %v296_v2, %s406_s17  ;;  %s475_s23 = sld [smem:[#allocation3 + $0x12]]  ;;  %s407_s15 = smov 2  }
  0x30   :  { %v157_v9 = vmul.f32 %v156_v7, %v76_v1  ;;  %v104_v10 = vstv %s300_s16  ;;  %s115_s24 = sld [smem:[#allocation3]]  ;;  %v518_v7 = vadd.s32 1, %v491_v29  ;;  %s408_s16 = smov 126  }
  0x31   :  { %v105_v12 = vmul.f32 %v296_v2, %v104_v10  ;;  %v160_v13 = vstv %s311_s18  ;;  %s314_s25 = sld [smem:[#allocation3 + $0xc]] }
  0x32   :  { %v161_v15 = vmul.f32 %v296_v2, %v160_v13  ;;  %v112_v16 = vstv %s302_s21  ;;  %s477_s26 = sld [smem:[#allocation3 + $0x2]]  ;;  %vm70_vm1 = vcmp.lt.s32.totalorder %v518_v7, 128 }
  0x33   :  { %v106_v17 = vadd.f32 %v105_v12, %v101_v8  ;;  %v113_v18 = vmul.f32 %v298_v3, %v112_v16  ;;  %v168_v19 = vstv %s313_s22  ;;  %95 = vrot.lane.b32.xlu0 %v297_v0, %s406_s17  ;;  %97 = vrot.lane.b32.xlu1 %v298_v3, %s406_s17  ;;  %s479_s2 = sld [smem:[#allocation3 + $0xe]] }
  0x34   :  { %v162_v20 = vadd.f32 %v161_v15, %v157_v9  ;;  %v169_v21 = vmul.f32 %v298_v3, %v168_v19  ;;  %s303_s1 = sld [smem:[#allocation3 + $0x3]]  ;;  %v124_v34 = vstv %s473_s0 }
  0x35   :  { %v110_v22 = vadd.f32 %v109_v11, %v106_v17  ;;  %s315_s27 = sld [smem:[#allocation3 + $0xf]]  ;;  %v180_v35 = vstv %s475_s23 }
  0x36   :  { %v166_v23 = vadd.f32 %v165_v14, %v162_v20  ;;  %s481_s28 = sld [smem:[#allocation3 + $0x9]]  ;;  %v116_v30 = vstv %s115_s24 }
  0x37   :  { %v469_v24 = vadd.f32 %v113_v18, %v110_v22  ;;  %s483_s29 = sld [smem:[#allocation3 + $0x15]]  ;;  %v172_v31 = vstv %s314_s25  ;;  %s409_s25 = smov [#allocation9]  }
  0x38   :  { %v471_v25 = vadd.f32 %v169_v21, %v166_v23  ;;  %s485_s30 = sld [smem:[#allocation3 + $0x5]]  ;;  %v134_v51 = vstv %s477_s26  ;;  %s286_s26 = sshll.u32 %s409_s25, 4  ;;  %s287_s26 = int_to_ptr.vmem [resolvable:$true] %s286_s26 }
  0x39   :  { %s487_s6 = sld [smem:[#allocation3 + $0x11]]  ;;  %v190_v52 = vstv %s479_s2  ;;  %s376_s2 = scalar_lea.vmem %s287_s26, 128 }
  0x3a   :  { %s489_s7 = sld [smem:[#allocation3 + $0x8]]  ;;  %v120_v32 = vstv %s303_s1  ;;  %p377_p1 = scmp.ne.s32.totalorder %s287_s26, %s376_s2 }
  0x3b   :  { %s493_s3 = sld [smem:[#allocation3 + $0x14]]  ;;  %v176_v33 = vstv %s315_s27  ;;  %p381_p2 = scmp.lt.s32.totalorder %s287_s26, %s287_s26 }
  0x3c   :  { %s495_s8 = sld [smem:[#allocation3 + $0xb]]  ;;  %v128_v43 = vstv %s481_s28  ;;  %p382_p3 = scmp.lt.s32.totalorder %s376_s2, %s376_s2 }
  0x3d   :  { %s497_s9 = sld [smem:[#allocation3 + $0x17]]  ;;  %v184_v44 = vstv %s483_s29 }
  0x3e   :  { %v138_v45 = vstv %s485_s30  ;;  %s513_s10 = sld [smem:[#allocation6]]  ;;  %p383_p4 = por %p382_p3, %p381_p2 }
  0x3f   :  { %v194_v46 = vstv %s487_s6  ;;  %s322_s12 = sld [smem:[#allocation6 + $0x1]] }
  0x40   :  { %v142_v55 = vstv %s489_s7  ;;  %s323_s13 = sld [smem:[#allocation8 + $0x2]]  ;;  %p384_p5 = pnand %p383_p4, %p377_p1 }
  0x41   :  { %v198_v56 = vstv %s493_s3  ;;  %s324_s14 = sld [smem:[#allocation8 + $0x7]] }
  0x42   :  { %v146_v63 = vstv %s495_s8  ;;  %s325_s18 = sld [smem:[#allocation8 + $0x5]] }
  0x43   :  { %v202_v0 = vstv %s497_s9  ;;  %s235_s19 = sld [smem:[#allocation8]] }
  0x44   :  { %v152_v22 = vstv %s513_s10  ;;  %s327_s20 = sld [smem:[#allocation8 + $0x6]] }
  0x45   :  { %v208_v23 = vstv %s322_s12  ;;  %s326_s21 = sld [smem:[#allocation8 + $0x1]] }
  0x46   :  { %s329_s22 = sld [smem:[#allocation8 + $0x8]] }
  0x47   :  { %s328_s0 = sld [smem:[#allocation8 + $0x3]] }
  0x99   :  { %v88_v27 = vpop.permute.xlu1 %87  ;;  %v84_v28 = vpop.permute.xlu0 %83 }
  0x9a   :  { %v117_v39 = vmul.f32 %v116_v30, %v84_v28  ;;  %v173_v40 = vmul.f32 %v172_v31, %v84_v28  ;;  %v125_v47 = vmul.f32 %v124_v34, %v88_v27  ;;  %v181_v48 = vmul.f32 %v180_v35, %v88_v27 }
  0x9b   :  { %v232_v34 = vstv %s324_s14 }
  0x9d   :  { %v92_v36 = vpop.permute.xlu1 %91  ;;  %v86_v37 = vpop.permute.xlu0 %85 }
  0x9e   :  { %v121_v41 = vmul.f32 %v120_v32, %v86_v37  ;;  %v177_v42 = vmul.f32 %v176_v33, %v86_v37  ;;  %v135_v1 = vmul.f32 %v134_v51, %v92_v36  ;;  %v191_v2 = vmul.f32 %v190_v52, %v92_v36 }
  0x9f   :  { %v228_v33 = vstv %s323_s13 }
  0xa0   :  { %v122_v49 = vadd.f32 %v121_v41, %v117_v39  ;;  %v178_v50 = vadd.f32 %v177_v42, %v173_v40  ;;  %v240_v39 = vstv %s325_s18  ;;  %v236_v40 = vstv %s235_s19 }
  0xa1   :  { %v90_v53 = vpop.permute.xlu1 %89  ;;  %v94_v54 = vpop.permute.xlu0 %93 }
  0xa2   :  { %v126_v57 = vadd.f32 %v125_v47, %v122_v49  ;;  %v129_v58 = vmul.f32 %v128_v43, %v90_v53  ;;  %v182_v59 = vadd.f32 %v181_v48, %v178_v50  ;;  %v185_v60 = vmul.f32 %v184_v44, %v90_v53 }
  0xa3   :  { %v139_v61 = vmul.f32 %v138_v45, %v94_v54  ;;  %v195_v62 = vmul.f32 %v194_v46, %v94_v54  ;;  %v60_v45 = vadd.s32 4294967294, %v491_v29  ;;  %v250_v46 = vstv %s327_s20 }
  0xa4   :  { %v130_v3 = vadd.f32 %v129_v58, %v126_v57  ;;  %v186_v4 = vadd.f32 %v185_v60, %v182_v59  ;;  %v246_v47 = vstv %s326_s21  ;;  %v260_v53 = vstv %s329_s22 }
  0xa5   :  { %v96_v5 = vpop.permute.xlu0 %95  ;;  %v98_v6 = vpop.permute.xlu1 %97  ;;  %v140_v8 = vadd.f32 %v139_v61, %v135_v1  ;;  %v196_v9 = vadd.f32 %v195_v62, %v191_v2  ;;  %vm61_vm2 = vcmp.ge.s32.totalorder %v60_v45, 0  ;;  %v256_v54 = vstv %s328_s0 }
  0xa6   :  { %v143_v10 = vmul.f32 %v142_v55, %v96_v5  ;;  %v199_v11 = vmul.f32 %v198_v56, %v96_v5  ;;  %v147_v12 = vmul.f32 %v146_v63, %v98_v6  ;;  %v203_v13 = vmul.f32 %v202_v0, %v98_v6 }
  0xa7   :  { %v131_v14 = vsel %vm65_vm0, %v130_v3, 0.0  ;;  %v187_v15 = vsel %vm65_vm0, %v186_v4, 0.0  ;;  %v72_v63 = vadd.s32 2, %v491_v29  ;;  %v276_v29 = vstv %s552_s4 }
  0xa8   :  { %v144_v16 = vadd.f32 %v143_v10, %v140_v8  ;;  %v200_v17 = vadd.f32 %v199_v11, %v196_v9  ;;  %v132_v20 = vadd.f32 %v131_v14, %v469_v24  ;;  %v188_v21 = vadd.f32 %v187_v15, %v471_v25 }
  0xa9   :  { %vm74_vm3 = vcmp.lt.s32.totalorder %v72_v63, 128 }
  0xaa   :  { %v148_v18 = vadd.f32 %v147_v12, %v144_v16  ;;  %v204_v19 = vadd.f32 %v203_v13, %v200_v17 }
  0xac   :  { %v149_v26 = vsel %vm70_vm1, %v148_v18, 0.0  ;;  %v205_v27 = vsel %vm70_vm1, %v204_v19, 0.0 }
  0xad   :  { %v150_v28 = vadd.f32 %v149_v26, %v132_v20  ;;  %v206_v30 = vadd.f32 %v205_v27, %v188_v21 }
  0xaf   :  { %v153_v31 = vadd.f32 %v152_v22, %v150_v28  ;;  %v209_v32 = vadd.f32 %v208_v23, %v206_v30 }
  0xb1   :  { %v154_v35 = vmax.f32 %v153_v31, 0.0  ;;  %v210_v36 = vmax.f32 %v209_v32, 0.0 }
  0xb3   :  { %213 = vrot.lane.b32.xlu1 %v210_v36, %s407_s15  ;;  %211 = vrot.lane.b32.xlu0 %v154_v35, %s407_s15  ;;  %v233_v24 = vmul.f32 %v232_v34, %v210_v36  ;;  %v229_v25 = vmul.f32 %v228_v33, %v154_v35 }
  0xb5   :  { %v234_v37 = vadd.f32 %v233_v24, %v229_v25 }
  0xb7   :  { %217 = vrot.lane.b32.xlu1 %v210_v36, %s405_s11  ;;  %215 = vrot.lane.b32.xlu0 %v154_v35, %s405_s11  ;;  %s331_s11 = sld [smem:[#allocation8 + $0x9]] }
  0xbb   :  { %221 = vrot.lane.b32.xlu1 %v210_v36, %s406_s17  ;;  %219 = vrot.lane.b32.xlu0 %v154_v35, %s406_s17  ;;  %s330_s17 = sld [smem:[#allocation8 + $0x4]] }
  0xbd   :  { %v270_v61 = vstv %s331_s11 }
  0xbf   :  { %225 = vrot.lane.b32.xlu1 %v210_v36, %s408_s16  ;;  %223 = vrot.lane.b32.xlu0 %v154_v35, %s408_s16 }
  0xc1   :  { %v266_v62 = vstv %s330_s17 }
 0x125   :  { %v214_v41 = vpop.permute.xlu1 %213  ;;  %v212_v42 = vpop.permute.xlu0 %211 }
 0x126   :  { %v241_v43 = vmul.f32 %v240_v39, %v214_v41  ;;  %v237_v44 = vmul.f32 %v236_v40, %v212_v42 }
 0x128   :  { %v242_v50 = vadd.f32 %v241_v43, %v237_v44 }
 0x129   :  { %v218_v48 = vpop.permute.xlu1 %217  ;;  %v216_v49 = vpop.permute.xlu0 %215 }
 0x12a   :  { %v251_v51 = vmul.f32 %v250_v46, %v218_v48  ;;  %v247_v52 = vmul.f32 %v246_v47, %v216_v49  ;;  %v243_v58 = vsel %vm61_vm2, %v242_v50, 0.0 }
 0x12b   :  { %v244_v2 = vadd.f32 %v243_v58, %v234_v37 }
 0x12c   :  { %v252_v55 = vadd.f32 %v251_v51, %v247_v52 }
 0x12d   :  { %v222_v56 = vpop.permute.xlu1 %221  ;;  %v220_v57 = vpop.permute.xlu0 %219 }
 0x12e   :  { %v261_v59 = vmul.f32 %v260_v53, %v222_v56  ;;  %v257_v60 = vmul.f32 %v256_v54, %v220_v57  ;;  %v253_v0 = vsel %vm65_vm0, %v252_v55, 0.0 }
 0x12f   :  { %v254_v9 = vadd.f32 %v253_v0, %v244_v2 }
 0x130   :  { %v262_v1 = vadd.f32 %v261_v59, %v257_v60 }
 0x131   :  { %v226_v3 = vpop.permute.xlu1 %225  ;;  %v224_v4 = vpop.permute.xlu0 %223 }
 0x132   :  { %v263_v5 = vsel %vm70_vm1, %v262_v1, 0.0  ;;  %v271_v6 = vmul.f32 %v270_v61, %v226_v3  ;;  %v267_v8 = vmul.f32 %v266_v62, %v224_v4 }
 0x133   :  { %v264_v11 = vadd.f32 %v263_v5, %v254_v9 }
 0x134   :  { %v272_v10 = vadd.f32 %v271_v6, %v267_v8 }
 0x136   :  { %v273_v12 = vsel %vm74_vm3, %v272_v10, 0.0 }
 0x137   :  { %v274_v38 = vadd.f32 %v273_v12, %v264_v11 }
 0x139   :  { %v277_v13 = vadd.f32 %v276_v29, %v274_v38 }
 0x13b   :  { %v278_v14 = vmax.f32 %v277_v13, 0.0 }
 0x13d   :  { %279 = vst [vmem:[#allocation9] sm:$0xff] %v278_v14 }
 0x13e   :  { %387 = shalt.err (!%p384_p5)
}
 0x13f   :  { %289 = dma.vmem_to_hbm [thread:$0]  %s287_s26, 128, %s553_s5, [#allocation4]  }
 0x140   :  { %400 = dma.done.wait [#allocation4], 128  }
 0x141   :  { %401 = vsyncadd [#allocation4], 4294967168 }
 0x142   :  { %293 = vsyncpa [#allocation4], 1 }
 0x143   :  { %294 = vsyncpa [#allocation5], 1 }
 0x144   :  { %295 = vsyncpa [#allocation7], 1 }

</bundles_post_ra>
